<compile_context>
chip_gen: v5e
topology: v5e:2x2
jax: 0.10.0
libtpu: 0.0.40
codegen_flags: <defaults>
</compile_context>

<pallas_src>
import functools

import jax
import jax.numpy as jnp
import numpy as np
from jax.experimental import pallas as pl
from jax.experimental.pallas import tpu as pltpu

# ----------------------------- model dims -----------------------------------
HIDDEN_DIM_GCN_ACTOR = 32
LINEAR_ACTOR = [256, 256]

NUM_JOINT = 8      # J
FEATURE_DIM = 4    # F
ACTION_DIM = 6     # A
BATCH = 2          # B

ACTION_SCALE = 1.0  # action_lim == None
ACTION_BIAS = 0.0


# ----------------------------- Pallas kernel --------------------------------
def _actor_kernel(xj_ref, adjb_ref, w1_ref, b1_ref, w2_ref, b2_ref,
                  wl1_ref, bl1_ref, wl2_ref, bl2_ref, wl3_ref, bl3_ref,
                  out_ref, flat_ref, *, num_joint, batch, hidden):
    # Single grid step: the full batch lives in VMEM.
    xj = xj_ref[...]        # (J*B, F)   joint-major flattened batch
    adjb = adjb_ref[...]    # (J*B, J*B) block-diagonal adjacency  adj ⊗ I_B

    # --- GCN layer 1: relu(adj @ x @ W1 + b1), batched via block-diag adj ---
    ax = jnp.dot(adjb, xj, preferred_element_type=jnp.float32)                # (J*B, F)
    h1 = jnp.dot(ax, w1_ref[...], preferred_element_type=jnp.float32)         # (J*B, H)
    h1 = jnp.maximum(h1 + b1_ref[...], 0.0)

    # --- GCN layer 2: adj @ h1 @ W2 + b2 (no relu, matching reference) ---
    ah1 = jnp.dot(adjb, h1, preferred_element_type=jnp.float32)               # (J*B, H)
    h2 = jnp.dot(ah1, w2_ref[...], preferred_element_type=jnp.float32) + b2_ref[...]

    # --- flatten (J*B, H) -> (B, J*H) into VMEM scratch (static slices only;
    #     avoids a minor-dim reshape inside the kernel).
    #     flat[b, j*H + h] = h2[j*B + b, h]
    for j in range(num_joint):  # static, tiny trip count (J stores of (B, H))
        flat_ref[:, j * hidden:(j + 1) * hidden] = h2[j * batch:(j + 1) * batch, :]
    flat = flat_ref[...]                                                       # (B, J*H)

    # --- l1_1: relu(flat @ Wl1 + bl1) -- one (B,256)@(256,256) MXU push ---
    a1 = jnp.dot(flat, wl1_ref[...], preferred_element_type=jnp.float32) + bl1_ref[...]
    a1 = jnp.maximum(a1, 0.0)

    # --- l1_2: relu ---
    a2 = jnp.dot(a1, wl2_ref[...], preferred_element_type=jnp.float32) + bl2_ref[...]
    a2 = jnp.maximum(a2, 0.0)

    # --- l1_3: tanh * scale + bias ---
    a3 = jnp.tanh(jnp.dot(a2, wl3_ref[...], preferred_element_type=jnp.float32)
                  + bl3_ref[...])
    out_ref[...] = a3 * ACTION_SCALE + ACTION_BIAS


def actor_forward(x, adj, params):
    """x: (B, J, F) f32, adj: (J, J) f32 -> actions (B, A) f32."""
    B, J, F = x.shape
    H = HIDDEN_DIM_GCN_ACTOR
    K = LINEAR_ACTOR[0]
    A = params["wl3"].shape[1]

    # Structural glue (layout only, tiny):
    #   joint-major flatten of the batch so in-kernel flatten slices are contiguous,
    #   block-diagonal adjacency so the batched GCN is a plain 2-D matmul.
    xj = jnp.swapaxes(x, 0, 1).reshape(J * B, F)              # (J*B, F)
    adjb = jnp.kron(adj, jnp.eye(B, dtype=adj.dtype))         # (J*B, J*B)

    full = lambda shape: pl.BlockSpec(shape, lambda i: (0,) * len(shape))
    kernel = functools.partial(_actor_kernel, num_joint=J, batch=B, hidden=H)

    return pl.pallas_call(
        kernel,
        out_shape=jax.ShapeDtypeStruct((B, A), jnp.float32),
        grid_spec=pltpu.PrefetchScalarGridSpec(
            num_scalar_prefetch=0,
            grid=(1,),                      # collapsed batch: one instance does all of B
            in_specs=[
                full((J * B, F)),        # xj
                full((J * B, J * B)),    # block-diag adjacency
                full((F, H)),            # gcn W1
                full((1, H)),            # gcn b1
                full((H, H)),            # gcn W2
                full((1, H)),            # gcn b2
                full((J * H, K)),        # l1_1 weight
                full((1, K)),            # l1_1 bias
                full((K, K)),            # l1_2 weight
                full((1, K)),            # l1_2 bias
                full((K, A)),            # l1_3 weight
                full((1, A)),            # l1_3 bias
            ],
            out_specs=pl.BlockSpec((B, A), lambda i: (0, 0)),
            scratch_shapes=[pltpu.VMEM((B, J * H), jnp.float32)],   # flatten buffer
        ),
        compiler_params=pltpu.CompilerParams(
            dimension_semantics=("arbitrary",)),
    )(xj, adjb,
      params["w1"], params["b1"], params["w2"], params["b2"],
      params["wl1"], params["bl1"], params["wl2"], params["bl2"],
      params["wl3"], params["bl3"])


# ----------------------------- reference (pure JAX) --------------------------
def actor_reference(x, adj, params):
    ax = jnp.einsum("ij,bjf->bif", adj, x)
    h1 = jax.nn.relu(ax @ params["w1"] + params["b1"])
    ah1 = jnp.einsum("ij,bjh->bih", adj, h1)
    h2 = ah1 @ params["w2"] + params["b2"]
    flat = h2.reshape(x.shape[0], -1)
    a = jax.nn.relu(flat @ params["wl1"] + params["bl1"])
    a = jax.nn.relu(a @ params["wl2"] + params["bl2"])
    a = jnp.tanh(a @ params["wl3"] + params["bl3"])
    return a * ACTION_SCALE + ACTION_BIAS


# ----------------------------- deterministic init ----------------------------
def init_params(key):
    J, F, H = NUM_JOINT, FEATURE_DIM, HIDDEN_DIM_GCN_ACTOR
    K, A = LINEAR_ACTOR[0], ACTION_DIM
    state_dim = J * H
    ks = jax.random.split(key, 10)
    s = lambda k, shape, fan_in: (jax.random.uniform(k, shape, jnp.float32,
                                                     -1.0, 1.0) / np.sqrt(fan_in))
    return {
        "w1": s(ks[0], (F, H), F),      "b1": s(ks[1], (1, H), F),
        "w2": s(ks[2], (H, H), H),      "b2": s(ks[3], (1, H), H),
        "wl1": s(ks[4], (state_dim, K), state_dim), "bl1": s(ks[5], (1, K), state_dim),
        "wl2": s(ks[6], (K, K), K),     "bl2": s(ks[7], (1, K), K),
        "wl3": s(ks[8], (K, A), K),     "bl3": s(ks[9], (1, A), K),
    }


# ----------------------------- main ------------------------------------------
if __name__ == "__main__":
    key = jax.random.PRNGKey(0)
    k_x, k_adj, k_p = jax.random.split(key, 3)

    x = jax.random.normal(k_x, (BATCH, NUM_JOINT, FEATURE_DIM), jnp.float32)
    # symmetric, row-normalized-ish adjacency (deterministic)
    raw = jax.random.uniform(k_adj, (NUM_JOINT, NUM_JOINT), jnp.float32)
    adj = (raw + raw.T) * 0.5 + jnp.eye(NUM_JOINT, dtype=jnp.float32)
    adj = adj / jnp.sum(adj, axis=-1, keepdims=True)

    params = init_params(k_p)

    out = actor_forward(x, adj, params)
    out = jax.block_until_ready(out)

    ref = actor_reference(x, adj, params)
    np.testing.assert_allclose(np.asarray(out), np.asarray(ref),
                               rtol=1e-5, atol=1e-5)
    print("KERNEL_OK")
</pallas_src>

<mosaic_0001>
module attributes {stable_mosaic.version = 11 : i64} {
  func.func @_actor_kernel(%arg0: i32, %arg1: memref<16x4xf32, #tpu.memory_space<vmem>>, %arg2: memref<16x16xf32, #tpu.memory_space<vmem>>, %arg3: memref<4x32xf32, #tpu.memory_space<vmem>>, %arg4: memref<1x32xf32, #tpu.memory_space<vmem>>, %arg5: memref<32x32xf32, #tpu.memory_space<vmem>>, %arg6: memref<1x32xf32, #tpu.memory_space<vmem>>, %arg7: memref<256x256xf32, #tpu.memory_space<vmem>>, %arg8: memref<1x256xf32, #tpu.memory_space<vmem>>, %arg9: memref<256x256xf32, #tpu.memory_space<vmem>>, %arg10: memref<1x256xf32, #tpu.memory_space<vmem>>, %arg11: memref<256x6xf32, #tpu.memory_space<vmem>>, %arg12: memref<1x6xf32, #tpu.memory_space<vmem>>, %arg13: memref<2x6xf32, #tpu.memory_space<vmem>>, %arg14: memref<2x256xf32, #tpu.memory_space<vmem>>) attributes {dimension_semantics = [#tpu.dimension_semantics<arbitrary>], iteration_bounds = array<i64: 1>, scalar_prefetch = 0 : i64, scratch_operands = 1 : i64, tpu.core_type = #tpu.core_type<tc>, window_params = [{pipeline_mode = #tpu.pipeline_mode<synchronous>, transform_indices = @transform_0, window_bounds = array<i64: 16, 4>}, {pipeline_mode = #tpu.pipeline_mode<synchronous>, transform_indices = @transform_1, window_bounds = array<i64: 16, 16>}, {pipeline_mode = #tpu.pipeline_mode<synchronous>, transform_indices = @transform_2, window_bounds = array<i64: 4, 32>}, {pipeline_mode = #tpu.pipeline_mode<synchronous>, transform_indices = @transform_3, window_bounds = array<i64: 1, 32>}, {pipeline_mode = #tpu.pipeline_mode<synchronous>, transform_indices = @transform_4, window_bounds = array<i64: 32, 32>}, {pipeline_mode = #tpu.pipeline_mode<synchronous>, transform_indices = @transform_5, window_bounds = array<i64: 1, 32>}, {pipeline_mode = #tpu.pipeline_mode<synchronous>, transform_indices = @transform_6, window_bounds = array<i64: 256, 256>}, {pipeline_mode = #tpu.pipeline_mode<synchronous>, transform_indices = @transform_7, window_bounds = array<i64: 1, 256>}, {pipeline_mode = #tpu.pipeline_mode<synchronous>, transform_indices = @transform_8, window_bounds = array<i64: 256, 256>}, {pipeline_mode = #tpu.pipeline_mode<synchronous>, transform_indices = @transform_9, window_bounds = array<i64: 1, 256>}, {pipeline_mode = #tpu.pipeline_mode<synchronous>, transform_indices = @transform_10, window_bounds = array<i64: 256, 6>}, {pipeline_mode = #tpu.pipeline_mode<synchronous>, transform_indices = @transform_11, window_bounds = array<i64: 1, 6>}, {pipeline_mode = #tpu.pipeline_mode<synchronous>, transform_indices = @transform_12, window_bounds = array<i64: 2, 6>}]} {
    %c0 = arith.constant 0 : index
    %c0_0 = arith.constant 0 : index
    %0 = vector.load %arg1[%c0, %c0_0] : memref<16x4xf32, #tpu.memory_space<vmem>>, vector<16x4xf32>
    %c0_1 = arith.constant 0 : index
    %c0_2 = arith.constant 0 : index
    %1 = vector.load %arg2[%c0_1, %c0_2] : memref<16x16xf32, #tpu.memory_space<vmem>>, vector<16x16xf32>
    %cst = arith.constant dense<0.000000e+00> : vector<16x4xf32>
    %2 = tpu.matmul %1, %0, %cst {dimension_numbers = #tpu.dot_dimension_numbers<[1], [0], [0], [1], [0, 0, 1, 1], [], []>} : vector<16x16xf32>, vector<16x4xf32>, vector<16x4xf32> -> vector<16x4xf32>
    %c0_3 = arith.constant 0 : index
    %c0_4 = arith.constant 0 : index
    %3 = vector.load %arg3[%c0_3, %c0_4] : memref<4x32xf32, #tpu.memory_space<vmem>>, vector<4x32xf32>
    %cst_5 = arith.constant dense<0.000000e+00> : vector<16x32xf32>
    %4 = tpu.matmul %2, %3, %cst_5 {dimension_numbers = #tpu.dot_dimension_numbers<[1], [0], [0], [1], [0, 0, 1, 1], [], []>} : vector<16x4xf32>, vector<4x32xf32>, vector<16x32xf32> -> vector<16x32xf32>
    %c0_6 = arith.constant 0 : index
    %c0_7 = arith.constant 0 : index
    %5 = vector.load %arg4[%c0_6, %c0_7] : memref<1x32xf32, #tpu.memory_space<vmem>>, vector<1x32xf32>
    %6 = vector.broadcast %5 : vector<1x32xf32> to vector<16x32xf32>
    %7 = arith.addf %4, %6 : vector<16x32xf32>
    %cst_8 = arith.constant 0.000000e+00 : f32
    %8 = vector.broadcast %cst_8 : f32 to vector<16x32xf32>
    %9 = arith.maximumf %7, %8 : vector<16x32xf32>
    %cst_9 = arith.constant dense<0.000000e+00> : vector<16x32xf32>
    %10 = tpu.matmul %1, %9, %cst_9 {dimension_numbers = #tpu.dot_dimension_numbers<[1], [0], [0], [1], [0, 0, 1, 1], [], []>} : vector<16x16xf32>, vector<16x32xf32>, vector<16x32xf32> -> vector<16x32xf32>
    %c0_10 = arith.constant 0 : index
    %c0_11 = arith.constant 0 : index
    %11 = vector.load %arg5[%c0_10, %c0_11] : memref<32x32xf32, #tpu.memory_space<vmem>>, vector<32x32xf32>
    %cst_12 = arith.constant dense<0.000000e+00> : vector<16x32xf32>
    %12 = tpu.matmul %10, %11, %cst_12 {dimension_numbers = #tpu.dot_dimension_numbers<[1], [0], [0], [1], [0, 0, 1, 1], [], []>} : vector<16x32xf32>, vector<32x32xf32>, vector<16x32xf32> -> vector<16x32xf32>
    %c0_13 = arith.constant 0 : index
    %c0_14 = arith.constant 0 : index
    %13 = vector.load %arg6[%c0_13, %c0_14] : memref<1x32xf32, #tpu.memory_space<vmem>>, vector<1x32xf32>
    %14 = vector.broadcast %13 : vector<1x32xf32> to vector<16x32xf32>
    %15 = arith.addf %12, %14 : vector<16x32xf32>
    %16 = vector.extract_strided_slice %15 {offsets = [0, 0], sizes = [2, 32], strides = [1, 1]} : vector<16x32xf32> to vector<2x32xf32>
    %c0_15 = arith.constant 0 : index
    %c0_16 = arith.constant 0 : index
    %17 = vector.load %arg14[%c0_15, %c0_16] : memref<2x256xf32, #tpu.memory_space<vmem>>, vector<2x32xf32>
    tpu.vector_store %arg14[%c0_15, %c0_16], %16 {strides = array<i32>} : memref<2x256xf32, #tpu.memory_space<vmem>>, vector<2x32xf32>,
    %18 = vector.extract_strided_slice %15 {offsets = [2, 0], sizes = [2, 32], strides = [1, 1]} : vector<16x32xf32> to vector<2x32xf32>
    %c0_17 = arith.constant 0 : index
    %c32 = arith.constant 32 : index
    %19 = vector.load %arg14[%c0_17, %c32] : memref<2x256xf32, #tpu.memory_space<vmem>>, vector<2x32xf32>
    tpu.vector_store %arg14[%c0_17, %c32], %18 {strides = array<i32>} : memref<2x256xf32, #tpu.memory_space<vmem>>, vector<2x32xf32>,
    %20 = vector.extract_strided_slice %15 {offsets = [4, 0], sizes = [2, 32], strides = [1, 1]} : vector<16x32xf32> to vector<2x32xf32>
    %c0_18 = arith.constant 0 : index
    %c64 = arith.constant 64 : index
    %21 = vector.load %arg14[%c0_18, %c64] : memref<2x256xf32, #tpu.memory_space<vmem>>, vector<2x32xf32>
    tpu.vector_store %arg14[%c0_18, %c64], %20 {strides = array<i32>} : memref<2x256xf32, #tpu.memory_space<vmem>>, vector<2x32xf32>,
    %22 = vector.extract_strided_slice %15 {offsets = [6, 0], sizes = [2, 32], strides = [1, 1]} : vector<16x32xf32> to vector<2x32xf32>
    %c0_19 = arith.constant 0 : index
    %c96 = arith.constant 96 : index
    %23 = vector.load %arg14[%c0_19, %c96] : memref<2x256xf32, #tpu.memory_space<vmem>>, vector<2x32xf32>
    tpu.vector_store %arg14[%c0_19, %c96], %22 {strides = array<i32>} : memref<2x256xf32, #tpu.memory_space<vmem>>, vector<2x32xf32>,
    %24 = vector.extract_strided_slice %15 {offsets = [8, 0], sizes = [2, 32], strides = [1, 1]} : vector<16x32xf32> to vector<2x32xf32>
    %c0_20 = arith.constant 0 : index
    %c128 = arith.constant 128 : index
    %25 = vector.load %arg14[%c0_20, %c128] : memref<2x256xf32, #tpu.memory_space<vmem>>, vector<2x32xf32>
    tpu.vector_store %arg14[%c0_20, %c128], %24 {strides = array<i32>} : memref<2x256xf32, #tpu.memory_space<vmem>>, vector<2x32xf32>,
    %26 = vector.extract_strided_slice %15 {offsets = [10, 0], sizes = [2, 32], strides = [1, 1]} : vector<16x32xf32> to vector<2x32xf32>
    %c0_21 = arith.constant 0 : index
    %c160 = arith.constant 160 : index
    %27 = vector.load %arg14[%c0_21, %c160] : memref<2x256xf32, #tpu.memory_space<vmem>>, vector<2x32xf32>
    tpu.vector_store %arg14[%c0_21, %c160], %26 {strides = array<i32>} : memref<2x256xf32, #tpu.memory_space<vmem>>, vector<2x32xf32>,
    %28 = vector.extract_strided_slice %15 {offsets = [12, 0], sizes = [2, 32], strides = [1, 1]} : vector<16x32xf32> to vector<2x32xf32>
    %c0_22 = arith.constant 0 : index
    %c192 = arith.constant 192 : index
    %29 = vector.load %arg14[%c0_22, %c192] : memref<2x256xf32, #tpu.memory_space<vmem>>, vector<2x32xf32>
    tpu.vector_store %arg14[%c0_22, %c192], %28 {strides = array<i32>} : memref<2x256xf32, #tpu.memory_space<vmem>>, vector<2x32xf32>,
    %30 = vector.extract_strided_slice %15 {offsets = [14, 0], sizes = [2, 32], strides = [1, 1]} : vector<16x32xf32> to vector<2x32xf32>
    %c0_23 = arith.constant 0 : index
    %c224 = arith.constant 224 : index
    %31 = vector.load %arg14[%c0_23, %c224] : memref<2x256xf32, #tpu.memory_space<vmem>>, vector<2x32xf32>
    tpu.vector_store %arg14[%c0_23, %c224], %30 {strides = array<i32>} : memref<2x256xf32, #tpu.memory_space<vmem>>, vector<2x32xf32>,
    %c0_24 = arith.constant 0 : index
    %c0_25 = arith.constant 0 : index
    %32 = vector.load %arg14[%c0_24, %c0_25] : memref<2x256xf32, #tpu.memory_space<vmem>>, vector<2x256xf32>
    %c0_26 = arith.constant 0 : index
    %c0_27 = arith.constant 0 : index
    %33 = vector.load %arg7[%c0_26, %c0_27] : memref<256x256xf32, #tpu.memory_space<vmem>>, vector<256x256xf32>
    %cst_28 = arith.constant dense<0.000000e+00> : vector<2x256xf32>
    %34 = tpu.matmul %32, %33, %cst_28 {dimension_numbers = #tpu.dot_dimension_numbers<[1], [0], [0], [1], [0, 0, 1, 1], [], []>} : vector<2x256xf32>, vector<256x256xf32>, vector<2x256xf32> -> vector<2x256xf32>
    %c0_29 = arith.constant 0 : index
    %c0_30 = arith.constant 0 : index
    %35 = vector.load %arg8[%c0_29, %c0_30] : memref<1x256xf32, #tpu.memory_space<vmem>>, vector<1x256xf32>
    %36 = vector.broadcast %35 : vector<1x256xf32> to vector<2x256xf32>
    %37 = arith.addf %34, %36 : vector<2x256xf32>
    %cst_31 = arith.constant 0.000000e+00 : f32
    %38 = vector.broadcast %cst_31 : f32 to vector<2x256xf32>
    %39 = arith.maximumf %37, %38 : vector<2x256xf32>
    %c0_32 = arith.constant 0 : index
    %c0_33 = arith.constant 0 : index
    %40 = vector.load %arg9[%c0_32, %c0_33] : memref<256x256xf32, #tpu.memory_space<vmem>>, vector<256x256xf32>
    %cst_34 = arith.constant dense<0.000000e+00> : vector<2x256xf32>
    %41 = tpu.matmul %39, %40, %cst_34 {dimension_numbers = #tpu.dot_dimension_numbers<[1], [0], [0], [1], [0, 0, 1, 1], [], []>} : vector<2x256xf32>, vector<256x256xf32>, vector<2x256xf32> -> vector<2x256xf32>
    %c0_35 = arith.constant 0 : index
    %c0_36 = arith.constant 0 : index
    %42 = vector.load %arg10[%c0_35, %c0_36] : memref<1x256xf32, #tpu.memory_space<vmem>>, vector<1x256xf32>
    %43 = vector.broadcast %42 : vector<1x256xf32> to vector<2x256xf32>
    %44 = arith.addf %41, %43 : vector<2x256xf32>
    %cst_37 = arith.constant 0.000000e+00 : f32
    %45 = vector.broadcast %cst_37 : f32 to vector<2x256xf32>
    %46 = arith.maximumf %44, %45 : vector<2x256xf32>
    %c0_38 = arith.constant 0 : index
    %c0_39 = arith.constant 0 : index
    %47 = vector.load %arg11[%c0_38, %c0_39] : memref<256x6xf32, #tpu.memory_space<vmem>>, vector<256x6xf32>
    %cst_40 = arith.constant dense<0.000000e+00> : vector<2x6xf32>
    %48 = tpu.matmul %46, %47, %cst_40 {dimension_numbers = #tpu.dot_dimension_numbers<[1], [0], [0], [1], [0, 0, 1, 1], [], []>} : vector<2x256xf32>, vector<256x6xf32>, vector<2x6xf32> -> vector<2x6xf32>
    %c0_41 = arith.constant 0 : index
    %c0_42 = arith.constant 0 : index
    %49 = vector.load %arg12[%c0_41, %c0_42] : memref<1x6xf32, #tpu.memory_space<vmem>>, vector<1x6xf32>
    %50 = vector.broadcast %49 : vector<1x6xf32> to vector<2x6xf32>
    %51 = arith.addf %48, %50 : vector<2x6xf32>
    %52 = math.tanh %51 : vector<2x6xf32>
    %cst_43 = arith.constant 1.000000e+00 : f32
    %53 = vector.broadcast %cst_43 : f32 to vector<2x6xf32>
    %54 = arith.mulf %52, %53 : vector<2x6xf32>
    %cst_44 = arith.constant 0.000000e+00 : f32
    %55 = vector.broadcast %cst_44 : f32 to vector<2x6xf32>
    %56 = arith.addf %54, %55 : vector<2x6xf32>
    %c0_45 = arith.constant 0 : index
    %c0_46 = arith.constant 0 : index
    %57 = vector.load %arg13[%c0_45, %c0_46] : memref<2x6xf32, #tpu.memory_space<vmem>>, vector<2x6xf32>
    tpu.vector_store %arg13[%c0_45, %c0_46], %56 {strides = array<i32>} : memref<2x6xf32, #tpu.memory_space<vmem>>, vector<2x6xf32>,
    return
  }
  func.func @transform_0(%arg0: i32) -> (i32, i32) {
    %c0_i32 = arith.constant 0 : i32
    %c0_i32_0 = arith.constant 0 : i32
    %c0_i32_1 = arith.constant 0 : i32
    return %c0_i32, %c0_i32_0 : i32, i32
  }
  func.func @transform_1(%arg0: i32) -> (i32, i32) {
    %c0_i32 = arith.constant 0 : i32
    %c0_i32_0 = arith.constant 0 : i32
    %c0_i32_1 = arith.constant 0 : i32
    return %c0_i32, %c0_i32_0 : i32, i32
  }
  func.func @transform_2(%arg0: i32) -> (i32, i32) {
    %c0_i32 = arith.constant 0 : i32
    %c0_i32_0 = arith.constant 0 : i32
    %c0_i32_1 = arith.constant 0 : i32
    return %c0_i32, %c0_i32_0 : i32, i32
  }
  func.func @transform_3(%arg0: i32) -> (i32, i32) {
    %c0_i32 = arith.constant 0 : i32
    %c0_i32_0 = arith.constant 0 : i32
    %c0_i32_1 = arith.constant 0 : i32
    return %c0_i32, %c0_i32_0 : i32, i32
  }
  func.func @transform_4(%arg0: i32) -> (i32, i32) {
    %c0_i32 = arith.constant 0 : i32
    %c0_i32_0 = arith.constant 0 : i32
    %c0_i32_1 = arith.constant 0 : i32
    return %c0_i32, %c0_i32_0 : i32, i32
  }
  func.func @transform_5(%arg0: i32) -> (i32, i32) {
    %c0_i32 = arith.constant 0 : i32
    %c0_i32_0 = arith.constant 0 : i32
    %c0_i32_1 = arith.constant 0 : i32
    return %c0_i32, %c0_i32_0 : i32, i32
  }
  func.func @transform_6(%arg0: i32) -> (i32, i32) {
    %c0_i32 = arith.constant 0 : i32
    %c0_i32_0 = arith.constant 0 : i32
    %c0_i32_1 = arith.constant 0 : i32
    return %c0_i32, %c0_i32_0 : i32, i32
  }
  func.func @transform_7(%arg0: i32) -> (i32, i32) {
    %c0_i32 = arith.constant 0 : i32
    %c0_i32_0 = arith.constant 0 : i32
    %c0_i32_1 = arith.constant 0 : i32
    return %c0_i32, %c0_i32_0 : i32, i32
  }
  func.func @transform_8(%arg0: i32) -> (i32, i32) {
    %c0_i32 = arith.constant 0 : i32
    %c0_i32_0 = arith.constant 0 : i32
    %c0_i32_1 = arith.constant 0 : i32
    return %c0_i32, %c0_i32_0 : i32, i32
  }
  func.func @transform_9(%arg0: i32) -> (i32, i32) {
    %c0_i32 = arith.constant 0 : i32
    %c0_i32_0 = arith.constant 0 : i32
    %c0_i32_1 = arith.constant 0 : i32
    return %c0_i32, %c0_i32_0 : i32, i32
  }
  func.func @transform_10(%arg0: i32) -> (i32, i32) {
    %c0_i32 = arith.constant 0 : i32
    %c0_i32_0 = arith.constant 0 : i32
    %c0_i32_1 = arith.constant 0 : i32
    return %c0_i32, %c0_i32_0 : i32, i32
  }
  func.func @transform_11(%arg0: i32) -> (i32, i32) {
    %c0_i32 = arith.constant 0 : i32
    %c0_i32_0 = arith.constant 0 : i32
    %c0_i32_1 = arith.constant 0 : i32
    return %c0_i32, %c0_i32_0 : i32, i32
  }
  func.func @transform_12(%arg0: i32) -> (i32, i32) {
    %c0_i32 = arith.constant 0 : i32
    %c0_i32_0 = arith.constant 0 : i32
    %c0_i32_1 = arith.constant 0 : i32
    return %c0_i32, %c0_i32_0 : i32, i32
  }
}

</mosaic_0001>

<bundles_post_ra>
// kernel: tpu_custom_call.1
= control target key start
LH: loop header
LB: loop body
LE: loop exit
PB: predicated region body
PF: predicated region fallthrough
CT: control target
= control target key end

     0   :  { %17 = vsyncpa [#allocation4], 0  ;;  %s999_s0 = inlined_call_operand.vmem [shape: f32[16,4], index: 0, kind: input, shape index: {}]   ;;  %s1000_s1 = inlined_call_operand.vmem [shape: f32[16,16], index: 1, kind: input, shape index: {}]   ;;  %s1001_s2 = inlined_call_operand.vmem [shape: f32[4,32], index: 2, kind: input, shape index: {}]   ;;  %s1002_s3 = inlined_call_operand.vmem [shape: f32[1,32], index: 3, kind: input, shape index: {}]   ;;  %s1003_s4 = inlined_call_operand.vmem [shape: f32[32,32], index: 4, kind: input, shape index: {}]   ;;  %s1004_s5 = inlined_call_operand.vmem [shape: f32[1,32], index: 5, kind: input, shape index: {}]   ;;  %s1005_s6 = inlined_call_operand.hbm [shape: f32[256,256], index: 6, kind: input, shape index: {}]   ;;  %s1006_s7 = inlined_call_operand.vmem [shape: f32[1,256], index: 7, kind: input, shape index: {}]   ;;  %s1007_s8 = inlined_call_operand.hbm [shape: f32[256,256], index: 8, kind: input, shape index: {}]   ;;  %s1008_s9 = inlined_call_operand.vmem [shape: f32[1,256], index: 9, kind: input, shape index: {}]   ;;  %s1009_s10 = inlined_call_operand.vmem [shape: f32[256,6], index: 10, kind: input, shape index: {}]   ;;  %s1010_s11 = inlined_call_operand.vmem [shape: f32[1,6], index: 11, kind: input, shape index: {}]   ;;  %s1011_s12 = inlined_call_operand.hbm [shape: f32[2,6], index: 12, kind: output, shape index: {}]  }
   0x1   :  { %18 = vsyncpa [#allocation7], 0 }
   0x2   :  { %19 = vsyncpa [#allocation5], 0  ;;  %s36_s23 = sshll.u32 %s1005_s6, 4  ;;  %s769_s24 = smov [#allocation3]   ;;  %s37_s23 = int_to_ptr.hbm [resolvable:$true] %s36_s23 }
   0x3   :  { %s38_s25 = sshll.u32 %s769_s24, 4  ;;  %s51_s28 = sshll.u32 %s1007_s8, 4  ;;  %s39_s25 = int_to_ptr.vmem [resolvable:$true] %s38_s25  ;;  %s52_s28 = int_to_ptr.hbm [resolvable:$true] %s51_s28 }
   0x4   :  { %s770_s29 = smov 256   ;;  %s771_s30 = smov 16  }
   0x5   :  { %44 = dma.hbm_to_vmem [thread:$0]  %s37_s23, 8192, %s39_s25, [#allocation4], %s770_s29, %s770_s29, %s771_s30  }
   0x6   :  { %s772_s13 = smov [#allocation6]  }
   0x7   :  { %s53_s14 = sshll.u32 %s772_s13, 4  ;;  %s54_s14 = int_to_ptr.vmem [resolvable:$true] %s53_s14 }
   0x8   :  { %59 = dma.hbm_to_vmem [thread:$0]  %s52_s28, 8192, %s54_s14, [#allocation7], %s770_s29, %s770_s29, %s771_s30  }
   0x9   :  { %763 = dma.done.wait [#allocation4], 8192  }
   0xa   :  { %764 = vsyncadd [#allocation4], 4294959104 }
   0xb   :  { %765 = dma.done.wait [#allocation7], 8192  }
   0xc   :  { %766 = vsyncadd [#allocation7], 4294959104  ;;  %v75_v0 = vld [vmem:[%s999_s0 + $0x8] sm:$0xff]  ;;  %v74_v1 = vld [vmem:[%s999_s0] sm:$0xff]  ;;  %vm78_vm0 = vcmask 130048   ;;  %vm120_vm1 = vcmask 1043456  }
   0xd   :  { %99 = vmatpush.msra.mxu2 %v75_v0  ;;  %v76_v2 = vld [vmem:[%s1000_s1] sm:$0xff]  ;;  %v77_v3 = vld [vmem:[%s1000_s1 + $0x8] sm:$0xff]  ;;  %vm113_vm2 = vcmask 31744   ;;  %v175_v7 = vld [vmem:[%s1003_s4 + $0x18] sm:$0xff]  ;;  %vm180_vm3 = vcmask 261120   ;;  %vm210_vm4 = vcmask 254976  }
   0xe   :  { %v108_v4 = vld [vmem:[%s1001_s2] sm:$0xf]  ;;  %v174_v8 = vld [vmem:[%s1003_s4 + $0x10] sm:$0xff]  ;;  %v173_v9 = vld [vmem:[%s1003_s4 + $0x8] sm:$0xff]  ;;  %s774_s13 = smov 64   ;;  %s775_s14 = smov 96  }
   0xf   :  { %100 = vmatpush.msra.mxu2 %v74_v1  ;;  %671 = vmatpush.msk.msra.mxu3 %vm120_vm1, %v108_v4  ;;  %v686_v11 = vld [vmem:[%s1002_s3] ss:$0 sm:$0xff]  ;;  %v292_v33 = vld [vmem:[#allocation3 + $0xf8] sm:$0xff]  ;;  %v289_v35 = vld [vmem:[#allocation3 + $0xe0] sm:$0xff]  ;;  %vm219_vm5 = vcmask 517376   ;;  %vm227_vm6 = vcmask 779776  }
  0x10   :  { %669 = vmatmul.msk.f32.vlgmr.msra.gmra.mxu2 %vm78_vm0, %v76_v2  ;;  %v172_v17 = vld [vmem:[%s1003_s4] sm:$0xff]  ;;  %s773_s4 = smov 32   ;;  %v321_v36 = vld [vmem:[#allocation3 + $0x1e0] sm:$0xff]  ;;  %v290_v37 = vld [vmem:[#allocation3 + $0xe8] sm:$0xff]  ;;  %vm235_vm7 = vcmask 1042176   ;;  %s658_s27 = sshll.u32 %s1011_s12, 4  ;;  %s659_s27 = int_to_ptr.hbm [resolvable:$true] %s658_s27 }
  0x11   :  { %199 = vmatpush.msrb.mxu3 %v175_v7  ;;  %v687_v20 = vld [vmem:[%s1004_s5] ss:$0 sm:$0xff]  ;;  %v324_v34 = vld [vmem:[#allocation3 + $0x1f8] sm:$0xff]  ;;  %v322_v38 = vld [vmem:[#allocation3 + $0x1e8] sm:$0xff]  ;;  %vm649_vm8 = vcmask 41984  }
  0x12   :  { %v291_v31 = vld [vmem:[#allocation3 + $0xf0] sm:$0xff]  ;;  %v288_v41 = vld [vmem:[#allocation3 + $0xd8] sm:$0xff]  ;;  %v285_v43 = vld [vmem:[#allocation3 + $0xc0] sm:$0xff] }
  0x13   :  { %200 = vmatpush.msrb.mxu3 %v174_v8  ;;  %v323_v32 = vld [vmem:[#allocation3 + $0x1f0] sm:$0xff]  ;;  %337 = vmatpush.msra.mxu1 %v291_v31  ;;  %v320_v42 = vld [vmem:[#allocation3 + $0x1d8] sm:$0xff]  ;;  %v317_v44 = vld [vmem:[#allocation3 + $0x1c0] sm:$0xff] }
  0x14   :  { %357 = vmatpush.msra.mxu0 %v323_v32  ;;  %v287_v39 = vld [vmem:[#allocation3 + $0xd0] sm:$0xff]  ;;  %v286_v45 = vld [vmem:[#allocation3 + $0xc8] sm:$0xff]  ;;  %v284_v49 = vld [vmem:[#allocation3 + $0xb8] sm:$0xff] }
  0x15   :  { %201 = vmatpush.msrb.mxu3 %v173_v9  ;;  %338 = vmatpush.msra.mxu1 %v289_v35  ;;  %v319_v40 = vld [vmem:[#allocation3 + $0x1d0] sm:$0xff]  ;;  %v318_v46 = vld [vmem:[#allocation3 + $0x1c8] sm:$0xff]  ;;  %v316_v50 = vld [vmem:[#allocation3 + $0x1b8] sm:$0xff] }
  0x16   :  { %358 = vmatpush.msra.mxu0 %v321_v36  ;;  %v283_v47 = vld [vmem:[#allocation3 + $0xb0] sm:$0xff]  ;;  %v281_v51 = vld [vmem:[#allocation3 + $0xa0] sm:$0xff]  ;;  %v282_v53 = vld [vmem:[#allocation3 + $0xa8] sm:$0xff] }
  0x17   :  { %202 = vmatpush.msrb.mxu3 %v172_v17  ;;  %339 = vmatpush.msra.mxu1 %v287_v39  ;;  %v315_v48 = vld [vmem:[#allocation3 + $0x1b0] sm:$0xff]  ;;  %v313_v52 = vld [vmem:[#allocation3 + $0x1a0] sm:$0xff]  ;;  %v314_v54 = vld [vmem:[#allocation3 + $0x1a8] sm:$0xff] }
  0x18   :  { %670 = vmatmul.msk.f32.gmra.mxu2 %vm78_vm0, %v77_v3  ;;  %359 = vmatpush.msra.mxu0 %v319_v40  ;;  %v279_v55 = vld [vmem:[#allocation3 + $0x90] sm:$0xff]  ;;  %v280_v57 = vld [vmem:[#allocation3 + $0x98] sm:$0xff]  ;;  %v277_v60 = vld [vmem:[#allocation3 + $0x80] sm:$0xff] }
  0x19   :  { %340 = vmatpush.msra.mxu1 %v285_v43  ;;  %v311_v56 = vld [vmem:[#allocation3 + $0x190] sm:$0xff]  ;;  %v312_v58 = vld [vmem:[#allocation3 + $0x198] sm:$0xff]  ;;  %v309_v61 = vld [vmem:[#allocation3 + $0x180] sm:$0xff] }
  0x1a   :  { %360 = vmatpush.msra.mxu0 %v317_v44  ;;  %v278_v62 = vld [vmem:[#allocation3 + $0x88] sm:$0xff]  ;;  %v275_v0 = vld [vmem:[#allocation3 + $0x70] sm:$0xff]  ;;  %v273_v4 = vld [vmem:[#allocation3 + $0x60] sm:$0xff] }
  0x1b   :  { %341 = vmatpush.msra.mxu1 %v283_v47  ;;  %v310_v63 = vld [vmem:[#allocation3 + $0x188] sm:$0xff]  ;;  %v307_v1 = vld [vmem:[#allocation3 + $0x170] sm:$0xff]  ;;  %v293_v31 = vld [vmem:[#allocation3 + $0x100] sm:$0xff] }
  0x1c   :  { %361 = vmatpush.msra.mxu0 %v315_v48  ;;  %v306_v7 = vld [vmem:[#allocation3 + $0x168] sm:$0xff]  ;;  %v271_v8 = vld [vmem:[#allocation3 + $0x50] sm:$0xff]  ;;  %v450_v35 = vld [vmem:[#allocation6 + $0xf8] sm:$0xff] }
  0x1d   :  { %342 = vmatpush.msra.mxu1 %v281_v51  ;;  %v303_v9 = vld [vmem:[#allocation3 + $0x150] sm:$0xff]  ;;  %v262_v32 = vld [vmem:[#allocation3 + $0x8] sm:$0xff]  ;;  %v447_v36 = vld [vmem:[#allocation6 + $0xe0] sm:$0xff] }
  0x1e   :  { %362 = vmatpush.msra.mxu0 %v313_v52  ;;  %v446_v39 = vld [vmem:[#allocation6 + $0xd8] sm:$0xff]  ;;  %v481_v40 = vld [vmem:[#allocation6 + $0x1f0] sm:$0xff]  ;;  %v443_v43 = vld [vmem:[#allocation6 + $0xc0] sm:$0xff] }
  0x1f   :  { %343 = vmatpush.msra.mxu1 %v279_v55  ;;  %v444_v44 = vld [vmem:[#allocation6 + $0xc8] sm:$0xff]  ;;  %v477_v47 = vld [vmem:[#allocation6 + $0x1d0] sm:$0xff]  ;;  %v478_v48 = vld [vmem:[#allocation6 + $0x1d8] sm:$0xff] }
  0x20   :  { %363 = vmatpush.msra.mxu0 %v311_v56  ;;  %v475_v51 = vld [vmem:[#allocation6 + $0x1c0] sm:$0xff]  ;;  %v476_v52 = vld [vmem:[#allocation6 + $0x1c8] sm:$0xff]  ;;  %v473_v55 = vld [vmem:[#allocation6 + $0x1b0] sm:$0xff] }
  0x21   :  { %344 = vmatpush.msra.mxu1 %v277_v60  ;;  %v474_v56 = vld [vmem:[#allocation6 + $0x1b8] sm:$0xff]  ;;  %v472_v60 = vld [vmem:[#allocation6 + $0x1a8] sm:$0xff] }
  0x22   :  { %364 = vmatpush.msra.mxu0 %v309_v61  ;;  %v435_v61 = vld [vmem:[#allocation6 + $0x80] sm:$0xff] }
  0x23   :  { %345 = vmatpush.msra.mxu1 %v275_v0  ;;  %v469_v0 = vld [vmem:[#allocation6 + $0x190] sm:$0xff] }
  0x24   :  { %365 = vmatpush.msra.mxu0 %v307_v1  ;;  %v470_v1 = vld [vmem:[#allocation6 + $0x198] sm:$0xff] }
  0x25   :  { %346 = vmatpush.msra.mxu1 %v273_v4  ;;  %v434_v4 = vld [vmem:[#allocation6 + $0x78] sm:$0xff] }
  0x27   :  { %347 = vmatpush.msra.mxu1 %v271_v8  ;;  %v432_v8 = vld [vmem:[#allocation6 + $0x68] sm:$0xff] }
  0x93   :  { %v102_v5 = vpop.f32.mrf.mxu2 }
  0x94   :  { %672 = vmatmul.msk.f32.vlgmr.msra.gmra.mxu3 %vm113_vm2, %v102_v5  ;;  %v305_v5 = vld [vmem:[#allocation3 + $0x160] sm:$0xff] }
  0x95   :  { %397 = vmatpush.msra.mxu3 %v324_v34  ;;  %366 = vmatpush.msra.mxu0 %v305_v5  ;;  %v449_v34 = vld [vmem:[#allocation6 + $0xf0] sm:$0xff]  ;;  %v467_v5 = vld [vmem:[#allocation6 + $0x180] sm:$0xff] }
  0x97   :  { %398 = vmatpush.msra.mxu3 %v322_v38  ;;  %367 = vmatpush.msra.mxu0 %v303_v9  ;;  %v445_v38 = vld [vmem:[#allocation6 + $0xd0] sm:$0xff] }
  0x98   :  { %v465_v9 = vld [vmem:[#allocation6 + $0x170] sm:$0xff] }
  0x99   :  { %399 = vmatpush.msra.mxu3 %v320_v42  ;;  %v479_v42 = vld [vmem:[#allocation6 + $0x1e0] sm:$0xff] }
  0x9b   :  { %v105_v6 = vpop.f32.mrf.mxu2  ;;  %400 = vmatpush.msra.mxu3 %v318_v46 }
  0x9c   :  { %673 = vmatmul.msk.f32.gmra.mxu3 %vm113_vm2, %v105_v6  ;;  %v274_v6 = vld [vmem:[#allocation3 + $0x68] sm:$0xff] }
  0x9d   :  { %401 = vmatpush.msra.mxu3 %v316_v50  ;;  %v442_v50 = vld [vmem:[#allocation6 + $0xb8] sm:$0xff] }
  0x9f   :  { %402 = vmatpush.msra.mxu3 %v314_v54  ;;  %v440_v54 = vld [vmem:[#allocation6 + $0xa8] sm:$0xff] }
  0xa1   :  { %403 = vmatpush.msra.mxu3 %v312_v58  ;;  %v438_v58 = vld [vmem:[#allocation6 + $0x98] sm:$0xff] }
  0xa3   :  { %404 = vmatpush.msra.mxu3 %v310_v63 }
 0x117   :  { %v141_v10 = vpop.f32.mrf.mxu3 }
 0x118   :  { %v142_v13 = vadd.f32 %v686_v11, %v141_v10  ;;  %v272_v10 = vld [vmem:[#allocation3 + $0x58] sm:$0xff] }
 0x11a   :  { %v147_v16 = vmax.f32 %v142_v13, 0.0  ;;  %v301_v13 = vld [vmem:[#allocation3 + $0x140] sm:$0xff] }
 0x11b   :  { %368 = vmatpush.msra.mxu0 %v301_v13  ;;  %v427_v13 = vld [vmem:[#allocation6 + $0x40] sm:$0xff] }
 0x11f   :  { %v144_v12 = vpop.f32.mrf.mxu3 }
 0x120   :  { %v145_v14 = vadd.f32 %v686_v11, %v144_v12  ;;  %v304_v11 = vld [vmem:[#allocation3 + $0x158] sm:$0xff]  ;;  %v269_v12 = vld [vmem:[#allocation3 + $0x40] sm:$0xff] }
 0x121   :  { %348 = vmatpush.msra.mxu1 %v269_v12  ;;  %v430_v12 = vld [vmem:[#allocation6 + $0x58] sm:$0xff] }
 0x122   :  { %v148_v15 = vmax.f32 %v145_v14, 0.0 }
 0x124   :  { %163 = vmatpush.msrb.mxu2 %v148_v15  ;;  %v270_v15 = vld [vmem:[#allocation3 + $0x48] sm:$0xff] }
 0x126   :  { %164 = vmatpush.msrb.mxu2 %v147_v16  ;;  %v302_v16 = vld [vmem:[#allocation3 + $0x148] sm:$0xff] }
 0x127   :  { %674 = vmatmul.msk.f32.vlgmr.msrb.gmra.mxu2 %vm78_vm0, %v76_v2  ;;  %v276_v2 = vld [vmem:[#allocation3 + $0x78] sm:$0xff] }
 0x128   :  { %377 = vmatpush.msra.mxu2 %v292_v33  ;;  %v294_v33 = vld [vmem:[#allocation3 + $0x108] sm:$0xff] }
 0x12a   :  { %378 = vmatpush.msra.mxu2 %v290_v37  ;;  %v448_v37 = vld [vmem:[#allocation6 + $0xe8] sm:$0xff] }
 0x12c   :  { %379 = vmatpush.msra.mxu2 %v288_v41  ;;  %v482_v41 = vld [vmem:[#allocation6 + $0x1f8] sm:$0xff] }
 0x12e   :  { %380 = vmatpush.msra.mxu2 %v286_v45  ;;  %v480_v45 = vld [vmem:[#allocation6 + $0x1e8] sm:$0xff] }
 0x12f   :  { %675 = vmatmul.msk.f32.gmra.mxu2 %vm78_vm0, %v77_v3  ;;  %v308_v3 = vld [vmem:[#allocation3 + $0x178] sm:$0xff] }
 0x130   :  { %381 = vmatpush.msra.mxu2 %v284_v49  ;;  %405 = vmatpush.msra.mxu3 %v308_v3  ;;  %v441_v49 = vld [vmem:[#allocation6 + $0xb0] sm:$0xff] }
 0x131   :  { %v433_v3 = vld [vmem:[#allocation6 + $0x70] sm:$0xff] }
 0x132   :  { %382 = vmatpush.msra.mxu2 %v282_v53  ;;  %406 = vmatpush.msra.mxu3 %v306_v7  ;;  %v439_v53 = vld [vmem:[#allocation6 + $0xa0] sm:$0xff] }
 0x133   :  { %v431_v7 = vld [vmem:[#allocation6 + $0x60] sm:$0xff] }
 0x134   :  { %383 = vmatpush.msra.mxu2 %v280_v57  ;;  %407 = vmatpush.msra.mxu3 %v304_v11  ;;  %v437_v57 = vld [vmem:[#allocation6 + $0x90] sm:$0xff] }
 0x135   :  { %v429_v11 = vld [vmem:[#allocation6 + $0x50] sm:$0xff] }
 0x136   :  { %384 = vmatpush.msra.mxu2 %v278_v62  ;;  %408 = vmatpush.msra.mxu3 %v302_v16  ;;  %v436_v62 = vld [vmem:[#allocation6 + $0x88] sm:$0xff] }
 0x138   :  { %385 = vmatpush.msra.mxu2 %v276_v2 }
 0x13a   :  { %386 = vmatpush.msra.mxu2 %v274_v6  ;;  %v468_v6 = vld [vmem:[#allocation6 + $0x188] sm:$0xff] }
 0x13c   :  { %387 = vmatpush.msra.mxu2 %v272_v10  ;;  %v466_v10 = vld [vmem:[#allocation6 + $0x178] sm:$0xff] }
 0x13e   :  { %388 = vmatpush.msra.mxu2 %v270_v15 }
 0x1aa   :  { %v166_v18 = vpop.f32.mrf.mxu2 }
 0x1ab   :  { %676 = vmatmul.msk.f32.vlgmr.msrb.gmra.mxu3 %vm180_vm3, %v166_v18  ;;  %v267_v18 = vld [vmem:[#allocation3 + $0x30] sm:$0xff] }
 0x1ac   :  { %349 = vmatpush.msra.mxu1 %v267_v18  ;;  %v425_v18 = vld [vmem:[#allocation6 + $0x30] sm:$0xff] }
 0x1b2   :  { %v169_v19 = vpop.f32.mrf.mxu2 }
 0x1b3   :  { %677 = vmatmul.msk.f32.gmra.mxu3 %vm180_vm3, %v169_v19  ;;  %v299_v19 = vld [vmem:[#allocation3 + $0x130] sm:$0xff] }
 0x1b4   :  { %369 = vmatpush.msra.mxu0 %v299_v19  ;;  %v463_v19 = vld [vmem:[#allocation6 + $0x160] sm:$0xff] }
 0x22e   :  { %v204_v21 = vpop.f32.mrf.mxu3 }
 0x22f   :  { %v205_v22 = vadd.f32 %v687_v20, %v204_v21  ;;  %v300_v21 = vld [vmem:[#allocation3 + $0x138] sm:$0xff] }
 0x230   :  { %409 = vmatpush.msra.mxu3 %v300_v21  ;;  %v464_v21 = vld [vmem:[#allocation6 + $0x168] sm:$0xff] }
 0x231   :  { %213 = vst.sshfl [vmem:[#allocation1] sm:$0xff pattern:$0x73625140] %v205_v22 }
 0x232   :  { %211 = vst.msk [vmem:[#allocation2] sm:$0x3] %vm210_vm4, %v205_v22 }
 0x236   :  { %v207_v23 = vpop.f32.mrf.mxu3 }
 0x237   :  { %v208_v24 = vadd.f32 %v687_v20, %v207_v23  ;;  %v268_v20 = vld [vmem:[#allocation3 + $0x38] sm:$0xff]  ;;  %v297_v23 = vld [vmem:[#allocation3 + $0x120] sm:$0xff] }
 0x238   :  { %v215_v25 = vld [vmem:[#allocation1 + $0x1] ss:$4 sm:$0xff]  ;;  %389 = vmatpush.msra.mxu2 %v268_v20  ;;  %370 = vmatpush.msra.mxu0 %v297_v23 }
 0x239   :  { %221 = vst.sshfl [vmem:[#allocation1] sm:$0xff pattern:$0x73625140] %v205_v22  ;;  %216 = vrot.lane.b32.xlu0 %v215_v25, %s773_s4  ;;  %v298_v25 = vld [vmem:[#allocation3 + $0x128] sm:$0xff]  ;;  %v426_v20 = vld [vmem:[#allocation6 + $0x38] sm:$0xff]  ;;  %v461_v23 = vld [vmem:[#allocation6 + $0x150] sm:$0xff] }
 0x23a   :  { %237 = vst.msk [vmem:[#allocation2 + $0x2] sm:$0x3] %vm210_vm4, %v208_v24  ;;  %410 = vmatpush.msra.mxu3 %v298_v25  ;;  %v462_v25 = vld [vmem:[#allocation6 + $0x158] sm:$0xff] }
 0x240   :  { %v223_v26 = vld [vmem:[#allocation1 + $0x2] ss:$4 sm:$0xff] }
 0x241   :  { %224 = vrot.lane.b32.xlu1 %v223_v26, %s774_s13  ;;  %229 = vst.sshfl [vmem:[#allocation1] sm:$0xff pattern:$0x73625140] %v205_v22  ;;  %v265_v22 = vld [vmem:[#allocation3 + $0x20] sm:$0xff]  ;;  %v263_v26 = vld [vmem:[#allocation3 + $0x10] sm:$0xff] }
 0x242   :  { %350 = vmatpush.msra.mxu1 %v265_v22  ;;  %v423_v22 = vld [vmem:[#allocation6 + $0x20] sm:$0xff] }
 0x244   :  { %351 = vmatpush.msra.mxu1 %v263_v26  ;;  %v421_v26 = vld [vmem:[#allocation6 + $0x10] sm:$0xff] }
 0x248   :  { %v231_v27 = vld [vmem:[#allocation1 + $0x3] ss:$4 sm:$0xff] }
 0x249   :  { %232 = vrot.lane.b32.xlu2 %v231_v27, %s775_s14  ;;  %239 = vst.sshfl [vmem:[#allocation1] sm:$0xff pattern:$0x73625140] %v208_v24  ;;  %v295_v27 = vld [vmem:[#allocation3 + $0x110] sm:$0xff] }
 0x24a   :  { %371 = vmatpush.msra.mxu0 %v295_v27  ;;  %v459_v27 = vld [vmem:[#allocation6 + $0x140] sm:$0xff] }
 0x24c   :  { %372 = vmatpush.msra.mxu0 %v293_v31  ;;  %v457_v31 = vld [vmem:[#allocation6 + $0x130] sm:$0xff] }
 0x24e   :  { %509 = vmatpush.msrb.mxu0 %v481_v40  ;;  %v586_v40 = vld [vmem:[%s1009_s10 + $0x78] sm:$0xff] }
 0x250   :  { %v241_v28 = vld [vmem:[#allocation1 + $0x1] ss:$4 sm:$0xff]  ;;  %510 = vmatpush.msrb.mxu0 %v479_v42 }
 0x251   :  { %242 = vrot.lane.b32.xlu0 %v241_v28, %s773_s4  ;;  %246 = vst.sshfl [vmem:[#allocation1] sm:$0xff pattern:$0x73625140] %v208_v24  ;;  %v264_v28 = vld [vmem:[#allocation3 + $0x18] sm:$0xff]  ;;  %v602_v42 = vld [vmem:[%s1009_s10 + $0xf8] sm:$0xff] }
 0x252   :  { %511 = vmatpush.msrb.mxu0 %v477_v47  ;;  %v599_v47 = vld [vmem:[%s1009_s10 + $0xe0] sm:$0xff] }
 0x254   :  { %512 = vmatpush.msrb.mxu0 %v475_v51  ;;  %v597_v51 = vld [vmem:[%s1009_s10 + $0xd0] sm:$0xff] }
 0x256   :  { %513 = vmatpush.msrb.mxu0 %v473_v55  ;;  %v579_v55 = vld [vmem:[%s1009_s10 + $0x40] sm:$0xff] }
 0x258   :  { %v248_v29 = vld [vmem:[#allocation1 + $0x2] ss:$4 sm:$0xff] }
 0x259   :  { %249 = vrot.lane.b32.xlu1 %v248_v29, %s774_s13  ;;  %253 = vst.sshfl [vmem:[#allocation1] sm:$0xff pattern:$0x73625140] %v208_v24  ;;  %v266_v24 = vld [vmem:[#allocation3 + $0x28] sm:$0xff]  ;;  %v296_v29 = vld [vmem:[#allocation3 + $0x118] sm:$0xff] }
 0x25a   :  { %390 = vmatpush.msra.mxu2 %v266_v24  ;;  %411 = vmatpush.msra.mxu3 %v296_v29  ;;  %v424_v24 = vld [vmem:[#allocation6 + $0x28] sm:$0xff] }
 0x25b   :  { %v460_v29 = vld [vmem:[#allocation6 + $0x148] sm:$0xff] }
 0x25c   :  { %391 = vmatpush.msra.mxu2 %v264_v28  ;;  %412 = vmatpush.msra.mxu3 %v294_v33  ;;  %v422_v28 = vld [vmem:[#allocation6 + $0x18] sm:$0xff] }
 0x25d   :  { %v458_v33 = vld [vmem:[#allocation6 + $0x138] sm:$0xff] }
 0x25e   :  { %392 = vmatpush.msra.mxu2 %v262_v32  ;;  %549 = vmatpush.msrb.mxu3 %v482_v41  ;;  %v420_v32 = vld [vmem:[#allocation6 + $0x8] sm:$0xff] }
 0x25f   :  { %v585_v41 = vld [vmem:[%s1009_s10 + $0x70] sm:$0xff] }
 0x260   :  { %v255_v30 = vld [vmem:[#allocation1 + $0x3] ss:$4 sm:$0xff]  ;;  %529 = vmatpush.msrb.mxu2 %v450_v35  ;;  %550 = vmatpush.msrb.mxu3 %v480_v45 }
 0x261   :  { %256 = vrot.lane.b32.xlu2 %v255_v30, %s775_s14  ;;  %v261_v30 = vld [vmem:[#allocation3] sm:$0xff]  ;;  %v456_v35 = vld [vmem:[#allocation6 + $0x128] sm:$0xff] }
 0x262   :  { %352 = vmatpush.msra.mxu1 %v261_v30  ;;  %530 = vmatpush.msrb.mxu2 %v448_v37  ;;  %v419_v30 = vld [vmem:[#allocation6] sm:$0xff]  ;;  %v454_v37 = vld [vmem:[#allocation6 + $0x118] sm:$0xff] }
 0x263   :  { %551 = vmatpush.msrb.mxu3 %v478_v48  ;;  %v600_v45 = vld [vmem:[%s1009_s10 + $0xe8] sm:$0xff]  ;;  %v582_v48 = vld [vmem:[%s1009_s10 + $0x58] sm:$0xff] }
 0x264   :  { %489 = vmatpush.msrb.mxu1 %v449_v34  ;;  %531 = vmatpush.msrb.mxu2 %v446_v39  ;;  %v455_v34 = vld [vmem:[#allocation6 + $0x120] sm:$0xff]  ;;  %v452_v39 = vld [vmem:[#allocation6 + $0x108] sm:$0xff] }
 0x265   :  { %552 = vmatpush.msrb.mxu3 %v476_v52  ;;  %v580_v52 = vld [vmem:[%s1009_s10 + $0x48] sm:$0xff] }
 0x266   :  { %490 = vmatpush.msrb.mxu1 %v447_v36  ;;  %532 = vmatpush.msrb.mxu2 %v444_v44  ;;  %v453_v36 = vld [vmem:[#allocation6 + $0x110] sm:$0xff]  ;;  %v601_v44 = vld [vmem:[%s1009_s10 + $0xf0] sm:$0xff] }
 0x267   :  { %553 = vmatpush.msrb.mxu3 %v474_v56  ;;  %v578_v56 = vld [vmem:[%s1009_s10 + $0x38] sm:$0xff] }
 0x268   :  { %491 = vmatpush.msrb.mxu1 %v445_v38  ;;  %533 = vmatpush.msrb.mxu2 %v442_v50  ;;  %v451_v38 = vld [vmem:[#allocation6 + $0x100] sm:$0xff] }
 0x269   :  { %554 = vmatpush.msrb.mxu3 %v472_v60  ;;  %v581_v50 = vld [vmem:[%s1009_s10 + $0x50] sm:$0xff] }
 0x26a   :  { %492 = vmatpush.msrb.mxu1 %v443_v43  ;;  %534 = vmatpush.msrb.mxu2 %v440_v54  ;;  %v584_v43 = vld [vmem:[%s1009_s10 + $0x68] sm:$0xff]  ;;  %v325_v54 = vld [vmem:[%s1006_s7] sm:$0x3] }
 0x26b   :  { %555 = vmatpush.msrb.mxu3 %v470_v1 }
 0x26c   :  { %493 = vmatpush.msrb.mxu1 %v441_v49  ;;  %535 = vmatpush.msrb.mxu2 %v438_v58  ;;  %v598_v49 = vld [vmem:[%s1009_s10 + $0xd8] sm:$0xff]  ;;  %v577_v58 = vld [vmem:[%s1009_s10 + $0x30] sm:$0xff] }
 0x26d   :  { %556 = vmatpush.msrb.mxu3 %v468_v6  ;;  %v576_v6 = vld [vmem:[%s1009_s10 + $0x28] sm:$0xff] }
 0x26e   :  { %494 = vmatpush.msrb.mxu1 %v439_v53  ;;  %536 = vmatpush.msrb.mxu2 %v436_v62  ;;  %v596_v53 = vld [vmem:[%s1009_s10 + $0xc8] sm:$0xff] }
 0x26f   :  { %557 = vmatpush.msrb.mxu3 %v466_v10  ;;  %v574_v10 = vld [vmem:[%s1009_s10 + $0x18] sm:$0xff] }
 0x270   :  { %495 = vmatpush.msrb.mxu1 %v437_v57  ;;  %537 = vmatpush.msrb.mxu2 %v434_v4  ;;  %v327_v57 = vperm.slane %v325_v54, 0 }
 0x271   :  { %558 = vmatpush.msrb.mxu3 %v464_v21  ;;  %v483_v21 = vld [vmem:[%s1008_s9] sm:$0x3]  ;;  %s776_s9 = smov [#allocation8]  }
 0x272   :  { %496 = vmatpush.msrb.mxu1 %v435_v61  ;;  %538 = vmatpush.msrb.mxu2 %v432_v8  ;;  %v575_v8 = vld [vmem:[%s1009_s10 + $0x20] sm:$0xff]  ;;  %s656_s1 = sshll.u32 %s776_s9, 4  ;;  %s657_s1 = int_to_ptr.vmem [resolvable:$true] %s656_s1 }
 0x273   :  { %559 = vmatpush.msrb.mxu3 %v462_v25 }
 0x274   :  { %497 = vmatpush.msrb.mxu1 %v433_v3  ;;  %539 = vmatpush.msrb.mxu2 %v430_v12  ;;  %v573_v12 = vld [vmem:[%s1009_s10 + $0x10] sm:$0xff] }
 0x275   :  { %560 = vmatpush.msrb.mxu3 %v460_v29 }
 0x276   :  { %498 = vmatpush.msrb.mxu1 %v431_v7  ;;  %v595_v7 = vld [vmem:[%s1009_s10 + $0xc0] sm:$0xff] }
 0x277   :  { %561 = vmatpush.msrb.mxu3 %v458_v33 }
 0x278   :  { %499 = vmatpush.msrb.mxu1 %v429_v11  ;;  %v593_v11 = vld [vmem:[%s1009_s10 + $0xb0] sm:$0xff] }
 0x279   :  { %562 = vmatpush.msrb.mxu3 %v456_v35 }
 0x27a   :  { %500 = vmatpush.msrb.mxu1 %v427_v13  ;;  %v592_v13 = vld [vmem:[%s1009_s10 + $0xa8] sm:$0xff] }
 0x27b   :  { %563 = vmatpush.msrb.mxu3 %v454_v37 }
 0x27c   :  { %501 = vmatpush.msrb.mxu1 %v425_v18  ;;  %v589_v18 = vld [vmem:[%s1009_s10 + $0x90] sm:$0xff] }
 0x27d   :  { %564 = vmatpush.msrb.mxu3 %v452_v39 }
 0x27e   :  { %502 = vmatpush.msrb.mxu1 %v423_v22  ;;  %v485_v22 = vperm.slane %v483_v21, 0 }
 0x280   :  { %503 = vmatpush.msrb.mxu1 %v421_v26 }
 0x282   :  { %504 = vmatpush.msrb.mxu1 %v419_v30 }
 0x2a3   :  { %v233_v17 = vpop.permute.xlu2 %232 }
 0x2ab   :  { %v217_v59 = vpop.permute.xlu0 %216 }
 0x2ac   :  { %220 = vst.msk [vmem:[#allocation2] sm:$0x3] %vm219_vm5, %v217_v59  ;;  %v471_v59 = vld [vmem:[#allocation6 + $0x1a0] sm:$0xff] }
 0x2ad   :  { %514 = vmatpush.msrb.mxu0 %v471_v59 }
 0x2af   :  { %515 = vmatpush.msrb.mxu0 %v469_v0 }
 0x2b1   :  { %516 = vmatpush.msrb.mxu0 %v467_v5 }
 0x2b3   :  { %v225_v14 = vpop.permute.xlu1 %224  ;;  %517 = vmatpush.msrb.mxu0 %v465_v9  ;;  %v594_v9 = vld [vmem:[%s1009_s10 + $0xb8] sm:$0xff] }
 0x2b4   :  { %228 = vst.msk [vmem:[#allocation2] sm:$0x3] %vm227_vm6, %v225_v14  ;;  %v428_v14 = vld [vmem:[#allocation6 + $0x48] sm:$0xff] }
 0x2b5   :  { %236 = vst.msk [vmem:[#allocation2] sm:$0x3] %vm235_vm7, %v233_v17  ;;  %540 = vmatpush.msrb.mxu2 %v428_v14  ;;  %518 = vmatpush.msrb.mxu0 %v463_v19  ;;  %v572_v14 = vld [vmem:[%s1009_s10 + $0x8] sm:$0xff] }
 0x2b6   :  { %v588_v19 = vld [vmem:[%s1009_s10 + $0x88] sm:$0xff] }
 0x2b7   :  { %541 = vmatpush.msrb.mxu2 %v426_v20  ;;  %519 = vmatpush.msrb.mxu0 %v461_v23  ;;  %v587_v20 = vld [vmem:[%s1009_s10 + $0x80] sm:$0xff] }
 0x2b9   :  { %542 = vmatpush.msrb.mxu2 %v424_v24  ;;  %520 = vmatpush.msrb.mxu0 %v459_v27  ;;  %v486_v27 = vperm.slane %v483_v21, 1 }
 0x2bb   :  { %v257_v2 = vpop.permute.xlu2 %256  ;;  %543 = vmatpush.msrb.mxu2 %v422_v28  ;;  %521 = vmatpush.msrb.mxu0 %v457_v31 }
 0x2bd   :  { %544 = vmatpush.msrb.mxu2 %v420_v32  ;;  %522 = vmatpush.msrb.mxu0 %v455_v34  ;;  %v688_v34 = vld [vmem:[%s1010_s11] ss:$0 sm:$0xff] }
 0x2bf   :  { %523 = vmatpush.msrb.mxu0 %v453_v36 }
 0x2c1   :  { %524 = vmatpush.msrb.mxu0 %v451_v38 }
 0x2c3   :  { %v243_v46 = vpop.permute.xlu0 %242 }
 0x2c4   :  { %245 = vst.msk [vmem:[#allocation2 + $0x2] sm:$0x3] %vm219_vm5, %v243_v46  ;;  %v583_v46 = vld [vmem:[%s1009_s10 + $0x60] sm:$0xff] }
 0x2cb   :  { %v250_v63 = vpop.permute.xlu1 %249 }
 0x2cc   :  { %252 = vst.msk [vmem:[#allocation2 + $0x2] sm:$0x3] %vm227_vm6, %v250_v63  ;;  %v328_v63 = vperm.slane %v325_v54, 1 }
 0x2cd   :  { %259 = vst.msk [vmem:[#allocation2 + $0x2] sm:$0x3] %vm235_vm7, %v257_v2 }
 0x2d4   :  { %v260_v15 = vld [vmem:[#allocation2] sm:$0xf] }
 0x2d5   :  { %332 = vst [vmem:[#allocation1] ss:$4 sm:$0xff] %v260_v15  ;;  %v591_v15 = vld [vmem:[%s1009_s10 + $0xa0] sm:$0xff] }
 0x2dc   :  { %v333_v16 = vld.sshfl [vmem:[#allocation1] sm:$0xff pattern:$0x73625140]  ;;  %v334_v17 = vld.sshfl [vmem:[#allocation1 + $0x8] sm:$0xff pattern:$0x73625140] }
 0x2dd   :  { %353 = vmatmul.f32.vlgmr.msra.gmra.mxu1 %v333_v16  ;;  %373 = vmatmul.f32.vlgmr.msra.gmra.mxu0 %v334_v17 }
 0x2de   :  { %393 = vmatmul.f32.vlgmr.msra.gmra.mxu2 %v333_v16  ;;  %413 = vmatmul.f32.vlgmr.msra.gmra.mxu3 %v334_v17  ;;  %v571_v16 = vld [vmem:[%s1009_s10] sm:$0xff]  ;;  %v590_v17 = vld [vmem:[%s1009_s10 + $0x98] sm:$0xff] }
 0x2df   :  { %607 = vmatpush.msra.mxu1 %v586_v40  ;;  %627 = vmatpush.msra.mxu0 %v602_v42 }
 0x2e1   :  { %608 = vmatpush.msra.mxu1 %v585_v41  ;;  %628 = vmatpush.msra.mxu0 %v601_v44 }
 0x2e3   :  { %609 = vmatpush.msra.mxu1 %v584_v43  ;;  %629 = vmatpush.msra.mxu0 %v600_v45 }
 0x2e5   :  { %610 = vmatpush.msra.mxu1 %v583_v46  ;;  %630 = vmatpush.msra.mxu0 %v599_v47 }
 0x2e7   :  { %611 = vmatpush.msra.mxu1 %v582_v48  ;;  %631 = vmatpush.msra.mxu0 %v598_v49 }
 0x2e9   :  { %612 = vmatpush.msra.mxu1 %v581_v50  ;;  %632 = vmatpush.msra.mxu0 %v597_v51 }
 0x2eb   :  { %613 = vmatpush.msra.mxu1 %v580_v52  ;;  %633 = vmatpush.msra.mxu0 %v596_v53 }
 0x2ed   :  { %614 = vmatpush.msra.mxu1 %v579_v55  ;;  %634 = vmatpush.msra.mxu0 %v595_v7 }
 0x2ef   :  { %615 = vmatpush.msra.mxu1 %v578_v56  ;;  %635 = vmatpush.msra.mxu0 %v594_v9 }
 0x2f1   :  { %616 = vmatpush.msra.mxu1 %v577_v58  ;;  %636 = vmatpush.msra.mxu0 %v593_v11 }
 0x2f3   :  { %617 = vmatpush.msra.mxu1 %v576_v6  ;;  %637 = vmatpush.msra.mxu0 %v592_v13 }
 0x2f5   :  { %618 = vmatpush.msra.mxu1 %v575_v8  ;;  %638 = vmatpush.msra.mxu0 %v591_v15 }
 0x2f7   :  { %619 = vmatpush.msra.mxu1 %v574_v10  ;;  %639 = vmatpush.msra.mxu0 %v590_v17 }
 0x2f9   :  { %620 = vmatpush.msra.mxu1 %v573_v12  ;;  %640 = vmatpush.msra.mxu0 %v589_v18 }
 0x2fb   :  { %621 = vmatpush.msra.mxu1 %v572_v14  ;;  %641 = vmatpush.msra.mxu0 %v588_v19 }
 0x2fd   :  { %622 = vmatpush.msra.mxu1 %v571_v16  ;;  %642 = vmatpush.msra.mxu0 %v587_v20 }
 0x35a   :  { %v354_v59 = vpop.f32.mrf.mxu1  ;;  %v374_v61 = vpop.f32.mrf.mxu0 }
 0x35b   :  { %v355_v60 = vadd.f32 %v354_v59, %v327_v57 }
 0x35d   :  { %v375_v62 = vadd.f32 %v374_v61, %v355_v60 }
 0x35f   :  { %v417_v0 = vmax.f32 %v375_v62, 0.0 }
 0x361   :  { %v394_v1 = vpop.f32.mrf.mxu2  ;;  %505 = vmatmul.f32.vlgmr.msrb.gmra.mxu1 %v417_v0  ;;  %545 = vmatmul.f32.vlgmr.msrb.gmra.mxu2 %v417_v0  ;;  %v414_v3 = vpop.f32.mrf.mxu3 }
 0x362   :  { %v395_v2 = vadd.f32 %v394_v1, %v328_v63 }
 0x364   :  { %v415_v4 = vadd.f32 %v414_v3, %v395_v2 }
 0x366   :  { %v418_v5 = vmax.f32 %v415_v4, 0.0 }
 0x368   :  { %525 = vmatmul.f32.vlgmr.msrb.gmra.mxu0 %v418_v5  ;;  %565 = vmatmul.f32.vlgmr.msrb.gmra.mxu3 %v418_v5 }
 0x3de   :  { %v506_v23 = vpop.f32.mrf.mxu1 }
 0x3df   :  { %v507_v24 = vadd.f32 %v506_v23, %v485_v22 }
 0x3e4   :  { %v546_v28 = vpop.f32.mrf.mxu2 }
 0x3e5   :  { %v526_v25 = vpop.f32.mrf.mxu0  ;;  %v547_v30 = vadd.f32 %v546_v28, %v486_v27 }
 0x3e6   :  { %v527_v26 = vadd.f32 %v526_v25, %v507_v24 }
 0x3e8   :  { %v569_v29 = vmax.f32 %v527_v26, 0.0 }
 0x3ea   :  { %623 = vmatmul.f32.vlgmr.msra.gmra.mxu1 %v569_v29 }
 0x3eb   :  { %v566_v31 = vpop.f32.mrf.mxu3 }
 0x3ec   :  { %v567_v32 = vadd.f32 %v566_v31, %v547_v30 }
 0x3ee   :  { %v570_v33 = vmax.f32 %v567_v32, 0.0 }
 0x3f0   :  { %643 = vmatmul.f32.vlgmr.msra.gmra.mxu0 %v570_v33 }
 0x467   :  { %v624_v35 = vpop.f32.mrf.mxu1 }
 0x468   :  { %v625_v36 = vadd.f32 %v688_v34, %v624_v35 }
 0x46d   :  { %v644_v37 = vpop.f32.mrf.mxu0 }
 0x46e   :  { %v645_v38 = vadd.f32 %v644_v37, %v625_v36 }
 0x470   :  { %689 = vtanh.f32 %v645_v38 }
 0x476   :  { %v690_v39 = vpop.eup %689 }
 0x477   :  { %650 = vst.msk [vmem:[#allocation8] sm:$0x3] %vm649_vm8, %v690_v39 }
 0x478   :  { %661 = dma.vmem_to_hbm [thread:$0]  %s657_s1, 32, %s659_s27, [#allocation5]  }
 0x479   :  { %767 = dma.done.wait [#allocation5], 32  }
 0x47a   :  { %768 = vsyncadd [#allocation5], 4294967264 }
 0x47b   :  { %666 = vsyncpa [#allocation4], 1 }
 0x47c   :  { %667 = vsyncpa [#allocation7], 1 }
 0x47d   :  { %668 = vsyncpa [#allocation5], 1 }

</bundles_post_ra>
